<compile_context>
chip_gen: v7x
topology: tpu7x:2x2x1
jax: 0.10.0
libtpu: 0.0.40
codegen_flags: <defaults>
</compile_context>

<pallas_src>
import math

import jax
import jax.numpy as jnp
from jax.experimental import pallas as pl
from jax.experimental.pallas import tpu as pltpu


def _round_up(x, m):
    return ((x + m - 1) // m) * m


def _vmem_capacity_bytes():
    try:
        cap = getattr(pltpu.get_tpu_info(), "vmem_capacity_bytes", None)
        if cap:
            return int(cap)
    except Exception:
        pass
    return 64 << 20          # conservative fallback = v7x per-TC VMEM


# ------------------------------------------------------------------ kernels ----

def ffn_resident_kernel(x_ref, w1_ref, b1_ref, w2_ref, b2_ref, o_ref):
    # x_ref: (tm, dim_p)  w1_ref: (dim_p, inner_p) bf16  b1_ref: (1, inner_p) f32
    # w2_ref: (inner_p, dim_p) bf16  b2_ref: (1, dim_p) f32  o_ref: (tm, dim_p)
    x = x_ref[...].astype(jnp.bfloat16)                  # no-op if x already bf16
    h = jnp.dot(x, w1_ref[...], preferred_element_type=jnp.float32)   # MXU
    # TODO(synk): on v6e/v7x the bias+ReLU+downcast epilogue could run in bf16 VALU if
    # it ever becomes the binding slot; kept f32 here (free filler under MXU slack).
    h = jnp.maximum(h + b1_ref[...], 0.0)                # bias + ReLU, f32 on VPU
    # Dropout(p=0.0) is a no-op in this module's default config.
    y = jnp.dot(h.astype(jnp.bfloat16), w2_ref[...],
                preferred_element_type=jnp.float32)
    o_ref[...] = (y + b2_ref[...]).astype(o_ref.dtype)


def ffn_tiled_kernel(x_ref, w1_ref, b1_ref, w2_ref, b2_ref, o_ref, acc_ref):
    # Grid: (row tiles i, inner chunks k).  x / out / acc revisited across k.
    k = pl.program_id(1)

    @pl.when(k == 0)
    def _():
        acc_ref[...] = jnp.zeros_like(acc_ref)

    x = x_ref[...].astype(jnp.bfloat16)
    h = jnp.dot(x, w1_ref[...], preferred_element_type=jnp.float32)
    h = jnp.maximum(h + b1_ref[...], 0.0)                # ReLU is elementwise over inner
    acc_ref[...] += jnp.dot(h.astype(jnp.bfloat16), w2_ref[...],
                            preferred_element_type=jnp.float32)

    @pl.when(k == pl.num_programs(1) - 1)
    def _():
        o_ref[...] = (acc_ref[...] + b2_ref[...]).astype(o_ref.dtype)


# ------------------------------------------------------------------ wrapper ----

def feed_forward(x, w1, b1, w2, b2, *, tm=None, tk_inner=None, force_tiled=False):
    """x: [B, S, dim]; w1: [dim, inner]; b1: [inner]; w2: [inner, dim]; b2: [dim]."""
    B, S, dim = x.shape
    inner = w1.shape[1]
    M = B * S
    xbytes = jnp.dtype(x.dtype).itemsize

    dim_p = _round_up(dim, 128)          # lane-dense loads AND unmasked output stores
    inner_128 = _round_up(inner, 128)

    # Generation-aware VMEM budget: ~85% of physical, never the full cap (Mosaic
    # internal scratch + double buffers need headroom).  v5e/v6e ~109 MiB, v7x ~54 MiB.
    vmem_cap = _vmem_capacity_bytes()
    usable = min(int(vmem_cap * 0.85), vmem_cap - (8 << 20))
    headroom = 6 << 20

    # Row-tile candidates: multiples of 256 (v6e/v7x MXU height) and 128 (v5e), grown
    # up to 1024 when M and VMEM permit; tiny inputs collapse to a single 8-aligned tile.
    M_al = _round_up(M, 8)
    if tm is None:
        tm_cands = [t for t in (1024, 512, 256, 128) if t <= M_al] or [M_al]
    else:
        tm_cands = [max(8, min(tm, M_al))]

    def resident_budget(tm_):
        return (2 * dim_p * inner_128 * 2          # W1 + W2 bf16, single-buffered
                + (inner_128 + dim_p) * 4          # biases
                + 2 * tm_ * dim_p * xbytes         # x tiles, double-buffered
                + 2 * tm_ * dim_p * xbytes         # out tiles, double-buffered
                + tm_ * inner_128 * (4 + 2)        # f32 h + its bf16 downcast
                + tm_ * dim_p * 4)                 # f32 y

    def tiled_budget(tm_, tk_):
        return (2 * tm_ * dim_p * xbytes           # x tile (revisited across k)
                + 2 * dim_p * tk_ * 2              # W1 column chunk, double-buffered
                + 2 * tk_ * dim_p * 2              # W2 row chunk, double-buffered
                + 2 * tk_ * 4 + dim_p * 4          # bias chunks
                + 2 * tm_ * dim_p * xbytes         # out tiles, double-buffered
                + tm_ * dim_p * 4                  # f32 accumulator scratch
                + tm_ * tk_ * (4 + 2)              # f32 h chunk + bf16 downcast
                + tm_ * dim_p * 4)                 # partial product

    use_resident = False
    tm_sel = tm_cands[-1]
    if not force_tiled:
        for t in tm_cands:                         # largest tile that fits resident plan
            if resident_budget(t) + headroom <= usable:
                tm_sel, use_resident = t, True
                break
    if not use_resident:
        for t in tm_cands:                         # largest tile that fits tiled plan
            if tiled_budget(t, 128) + headroom <= usable:
                tm_sel = t
                break
    tm = tm_sel
    M_pad = _round_up(M, tm)

    if use_resident:
        inner_p = inner_128
        tk = inner_p
    else:
        # Weight-tiled fallback: stream W1 columns / W2 rows in tk-wide chunks.
        tk = min(_round_up(tk_inner, 128), inner_128) if tk_inner else inner_128
        while tk > 128 and tiled_budget(tm, tk) + headroom > usable:
            tk = max(128, _round_up(tk // 2, 128))
        inner_p = _round_up(inner, tk)             # multiple of tk (and of 128)

    # ---- pad operands (zeros are mathematically inert here) ----
    x2 = x.reshape(M, dim)
    if M_pad != M or dim_p != dim:
        x2 = jnp.pad(x2, ((0, M_pad - M), (0, dim_p - dim)))
    # bf16 weights halve weight DMA/VMEM and hit MXU peak; biases stay f32.
    # TODO(synk): fp8 weights (+ per-channel scales) on v7x would halve the resident
    # footprint again; cross-TC inner-sharding of weights also not implemented.
    w1b = jnp.pad(w1.astype(jnp.bfloat16), ((0, dim_p - dim), (0, inner_p - inner)))
    w2b = jnp.pad(w2.astype(jnp.bfloat16), ((0, inner_p - inner), (0, dim_p - dim)))
    b1_2 = jnp.pad(b1.astype(jnp.float32), (0, inner_p - inner)).reshape(1, inner_p)
    b2_2 = jnp.pad(b2.astype(jnp.float32), (0, dim_p - dim)).reshape(1, dim_p)

    n_row_tiles = M_pad // tm
    weight_reads = 1 if use_resident else n_row_tiles
    cost = pl.CostEstimate(
        flops=2 * 2 * M_pad * dim_p * inner_p,
        transcendentals=0,
        bytes_accessed=(x2.size * xbytes
                        + weight_reads * (w1b.size * 2 + w2b.size * 2)
                        + (inner_p + dim_p) * 4
                        + M_pad * dim_p * xbytes),
    )

    resident = pl.Buffered(1)   # constant-index blocks: no double buffering needed
    vmem_limit = usable

    if use_resident:
        out = pl.pallas_call(
            ffn_resident_kernel,
            out_shape=jax.ShapeDtypeStruct((M_pad, dim_p), x.dtype),
            grid_spec=pltpu.PrefetchScalarGridSpec(
                num_scalar_prefetch=0,
                grid=(n_row_tiles,),
                in_specs=[
                    pl.BlockSpec((tm, dim_p), lambda i: (i, 0)),                            # x tile
                    pl.BlockSpec((dim_p, inner_p), lambda i: (0, 0), pipeline_mode=resident),  # W1
                    pl.BlockSpec((1, inner_p), lambda i: (0, 0), pipeline_mode=resident),      # b1
                    pl.BlockSpec((inner_p, dim_p), lambda i: (0, 0), pipeline_mode=resident),  # W2
                    pl.BlockSpec((1, dim_p), lambda i: (0, 0), pipeline_mode=resident),        # b2
                ],
                out_specs=pl.BlockSpec((tm, dim_p), lambda i: (i, 0)),
            ),
            compiler_params=pltpu.CompilerParams(
                dimension_semantics=("parallel",),          # row axis shards across TCs
                vmem_limit_bytes=vmem_limit,
            ),
            cost_estimate=cost,
        )(x2, w1b, b1_2, w2b, b2_2)
    else:
        out = pl.pallas_call(
            ffn_tiled_kernel,
            out_shape=jax.ShapeDtypeStruct((M_pad, dim_p), x.dtype),
            grid_spec=pltpu.PrefetchScalarGridSpec(
                num_scalar_prefetch=0,
                grid=(n_row_tiles, inner_p // tk),
                in_specs=[
                    pl.BlockSpec((tm, dim_p), lambda i, k: (i, 0)),                         # x tile
                    pl.BlockSpec((dim_p, tk), lambda i, k: (0, k)),                         # W1 cols
                    pl.BlockSpec((1, tk), lambda i, k: (0, k)),                             # b1 chunk
                    pl.BlockSpec((tk, dim_p), lambda i, k: (k, 0)),                         # W2 rows
                    pl.BlockSpec((1, dim_p), lambda i, k: (0, 0), pipeline_mode=resident),  # b2
                ],
                out_specs=pl.BlockSpec((tm, dim_p), lambda i, k: (i, 0)),
                scratch_shapes=[pltpu.VMEM((tm, dim_p), jnp.float32)],
            ),
            compiler_params=pltpu.CompilerParams(
                dimension_semantics=("parallel", "arbitrary"),
                vmem_limit_bytes=vmem_limit,
            ),
            cost_estimate=cost,
        )(x2, w1b, b1_2, w2b, b2_2)

    if M_pad != M or dim_p != dim:
        out = out[:M, :dim]
    return out.reshape(B, S, dim)


def init_params(key, dim, mult=4, dtype=jnp.float32):
    """Deterministic PyTorch-style (kaiming-uniform-ish) init for both Linears."""
    inner = int(dim * mult)
    k1, k2, k3, k4 = jax.random.split(key, 4)
    bound1 = 1.0 / math.sqrt(dim)     # Linear(dim -> inner)
    bound2 = 1.0 / math.sqrt(inner)   # Linear(inner -> dim)
    # Stored already transposed to [in, out] for the kernel.
    w1 = jax.random.uniform(k1, (dim, inner), dtype, minval=-bound1, maxval=bound1)
    b1 = jax.random.uniform(k2, (inner,), dtype, minval=-bound1, maxval=bound1)
    w2 = jax.random.uniform(k3, (inner, dim), dtype, minval=-bound2, maxval=bound2)
    b2 = jax.random.uniform(k4, (dim,), dtype, minval=-bound2, maxval=bound2)
    return w1, b1, w2, b2


if __name__ == "__main__":
    key = jax.random.PRNGKey(0)
    B, S, dim, mult = 2, 8, 32, 4          # inner_dim = 128
    kx, kp, kp2 = jax.random.split(key, 3)
    x = jax.random.normal(kx, (B, S, dim), jnp.float32)

    def ref_ffn(x, w1, b1, w2, b2):
        d = x.shape[-1]
        return (jnp.maximum(x.reshape(-1, d) @ w1 + b1, 0.0) @ w2 + b2).reshape(x.shape)

    # Path A: weight-resident streaming plan (auto-selected).  bf16 MXU operands with
    # f32 accumulation -> compare at bf16-level tolerance.
    w1, b1, w2, b2 = init_params(kp, dim, mult)
    y = jax.block_until_ready(feed_forward(x, w1, b1, w2, b2))
    ref = ref_ffn(x, w1, b1, w2, b2)
    assert jnp.allclose(y, ref, atol=2e-2, rtol=2e-2), "resident path mismatch"

    # Path B: weight-tiled fallback (forced), inner=256 split into two 128-wide chunks
    # to exercise the k-axis accumulator (zero at k==0, write at k==last).
    w1t, b1t, w2t, b2t = init_params(kp2, dim, 8)
    y2 = jax.block_until_ready(
        feed_forward(x, w1t, b1t, w2t, b2t, force_tiled=True, tk_inner=128))
    ref2 = ref_ffn(x, w1t, b1t, w2t, b2t)
    assert jnp.allclose(y2, ref2, atol=2e-2, rtol=2e-2), "tiled path mismatch"

    # TODO(synk): dropout with p > 0 (training mode) is not implemented; module default
    # p = 0.0 makes it a no-op in the forward pass.
    print("KERNEL_OK")
</pallas_src>

<mosaic_0001>
module attributes {stable_mosaic.version = 11 : i64} {
  func.func @ffn_resident_kernel(%arg0: i32, %arg1: memref<16x128xf32, #tpu.memory_space<vmem>>, %arg2: memref<128x128xbf16, #tpu.memory_space<vmem>>, %arg3: memref<1x128xf32, #tpu.memory_space<vmem>>, %arg4: memref<128x128xbf16, #tpu.memory_space<vmem>>, %arg5: memref<1x128xf32, #tpu.memory_space<vmem>>, %arg6: memref<16x128xf32, #tpu.memory_space<vmem>>) attributes {dimension_semantics = [#tpu.dimension_semantics<parallel>], iteration_bounds = array<i64: 1>, scalar_prefetch = 0 : i64, scratch_operands = 0 : i64, tpu.core_type = #tpu.core_type<tc>, window_params = [{transform_indices = @transform_0, window_bounds = array<i64: 16, 128>}, {pipeline_mode = #tpu.pipeline_mode<synchronous>, transform_indices = @transform_1, window_bounds = array<i64: 128, 128>}, {pipeline_mode = #tpu.pipeline_mode<synchronous>, transform_indices = @transform_2, window_bounds = array<i64: 1, 128>}, {pipeline_mode = #tpu.pipeline_mode<synchronous>, transform_indices = @transform_3, window_bounds = array<i64: 128, 128>}, {pipeline_mode = #tpu.pipeline_mode<synchronous>, transform_indices = @transform_4, window_bounds = array<i64: 1, 128>}, {transform_indices = @transform_5, window_bounds = array<i64: 16, 128>}]} {
    %c0 = arith.constant 0 : index
    %c0_0 = arith.constant 0 : index
    %0 = vector.load %arg1[%c0, %c0_0] : memref<16x128xf32, #tpu.memory_space<vmem>>, vector<16x128xf32>
    %1 = arith.truncf %0 : vector<16x128xf32> to vector<16x128xbf16>
    %c0_1 = arith.constant 0 : index
    %c0_2 = arith.constant 0 : index
    %2 = vector.load %arg2[%c0_1, %c0_2] : memref<128x128xbf16, #tpu.memory_space<vmem>>, vector<128x128xbf16>
    %cst = arith.constant dense<0.000000e+00> : vector<16x128xf32>
    %3 = tpu.matmul %1, %2, %cst {dimension_numbers = #tpu.dot_dimension_numbers<[1], [0], [0], [1], [0, 0, 1, 1], [], []>} : vector<16x128xbf16>, vector<128x128xbf16>, vector<16x128xf32> -> vector<16x128xf32>
    %c0_3 = arith.constant 0 : index
    %c0_4 = arith.constant 0 : index
    %4 = vector.load %arg3[%c0_3, %c0_4] : memref<1x128xf32, #tpu.memory_space<vmem>>, vector<1x128xf32>
    %5 = vector.broadcast %4 : vector<1x128xf32> to vector<16x128xf32>
    %6 = arith.addf %3, %5 : vector<16x128xf32>
    %cst_5 = arith.constant 0.000000e+00 : f32
    %7 = vector.broadcast %cst_5 : f32 to vector<16x128xf32>
    %8 = arith.maximumf %6, %7 : vector<16x128xf32>
    %9 = arith.truncf %8 : vector<16x128xf32> to vector<16x128xbf16>
    %c0_6 = arith.constant 0 : index
    %c0_7 = arith.constant 0 : index
    %10 = vector.load %arg4[%c0_6, %c0_7] : memref<128x128xbf16, #tpu.memory_space<vmem>>, vector<128x128xbf16>
    %cst_8 = arith.constant dense<0.000000e+00> : vector<16x128xf32>
    %11 = tpu.matmul %9, %10, %cst_8 {dimension_numbers = #tpu.dot_dimension_numbers<[1], [0], [0], [1], [0, 0, 1, 1], [], []>} : vector<16x128xbf16>, vector<128x128xbf16>, vector<16x128xf32> -> vector<16x128xf32>
    %c0_9 = arith.constant 0 : index
    %c0_10 = arith.constant 0 : index
    %12 = vector.load %arg5[%c0_9, %c0_10] : memref<1x128xf32, #tpu.memory_space<vmem>>, vector<1x128xf32>
    %13 = vector.broadcast %12 : vector<1x128xf32> to vector<16x128xf32>
    %14 = arith.addf %11, %13 : vector<16x128xf32>
    %c0_11 = arith.constant 0 : index
    %c0_12 = arith.constant 0 : index
    %15 = vector.load %arg6[%c0_11, %c0_12] : memref<16x128xf32, #tpu.memory_space<vmem>>, vector<16x128xf32>
    tpu.vector_store %arg6[%c0_11, %c0_12], %14 {strides = array<i32>} : memref<16x128xf32, #tpu.memory_space<vmem>>, vector<16x128xf32>,
    return
  }
  func.func @transform_0(%arg0: i32) -> (i32, i32) {
    %c0_i32 = arith.constant 0 : i32
    %c0_i32_0 = arith.constant 0 : i32
    return %arg0, %c0_i32 : i32, i32
  }
  func.func @transform_1(%arg0: i32) -> (i32, i32) {
    %c0_i32 = arith.constant 0 : i32
    %c0_i32_0 = arith.constant 0 : i32
    %c0_i32_1 = arith.constant 0 : i32
    return %c0_i32, %c0_i32_0 : i32, i32
  }
  func.func @transform_2(%arg0: i32) -> (i32, i32) {
    %c0_i32 = arith.constant 0 : i32
    %c0_i32_0 = arith.constant 0 : i32
    %c0_i32_1 = arith.constant 0 : i32
    return %c0_i32, %c0_i32_0 : i32, i32
  }
  func.func @transform_3(%arg0: i32) -> (i32, i32) {
    %c0_i32 = arith.constant 0 : i32
    %c0_i32_0 = arith.constant 0 : i32
    %c0_i32_1 = arith.constant 0 : i32
    return %c0_i32, %c0_i32_0 : i32, i32
  }
  func.func @transform_4(%arg0: i32) -> (i32, i32) {
    %c0_i32 = arith.constant 0 : i32
    %c0_i32_0 = arith.constant 0 : i32
    %c0_i32_1 = arith.constant 0 : i32
    return %c0_i32, %c0_i32_0 : i32, i32
  }
  func.func @transform_5(%arg0: i32) -> (i32, i32) {
    %c0_i32 = arith.constant 0 : i32
    %c0_i32_0 = arith.constant 0 : i32
    return %arg0, %c0_i32 : i32, i32
  }
}

</mosaic_0001>

<bundles_post_ra>
// kernel: tpu_custom_call.1
= control target key start
LH: loop header
LB: loop body
LE: loop exit
PB: predicated region body
PF: predicated region fallthrough
CT: control target
= control target key end

     0   :  { %10 = vsyncpa [#allocation3], 0  ;;  %s615_s0 = inlined_call_operand.hbm [shape: f32[16,128], index: 0, kind: input, shape index: {}]   ;;  %s616_s1 = inlined_call_operand.hbm [shape: bf16[128,128], index: 1, kind: input, shape index: {}]   ;;  %s617_s2 = inlined_call_operand.vmem [shape: f32[1,128], index: 2, kind: input, shape index: {}]   ;;  %s618_s3 = inlined_call_operand.hbm [shape: bf16[128,128], index: 3, kind: input, shape index: {}]   ;;  %s619_s4 = inlined_call_operand.vmem [shape: f32[1,128], index: 4, kind: input, shape index: {}]   ;;  %s620_s5 = inlined_call_operand.hbm [shape: f32[16,128], index: 5, kind: output, shape index: {}]  }
   0x1   :  { %11 = vsyncpa [#allocation6], 0 }
   0x2   :  { %12 = vsyncpa [#allocation4], 0  ;;  %s509_s18 = smov [#allocation5]   ;;  %s415_s22 = scalar_lea.hbm %s616_s1, 1024 }
   0x3   :  { %s30_s19 = sshll.u32 %s509_s18, 4  ;;  %p416_p0 = scmp.ne.s32.totalorder %s616_s1, %s415_s22  ;;  %s31_s19 = int_to_ptr.vmem [resolvable:$true] %s30_s19 }
   0x4   :  { %p419_p1 = scmp.lt.u32.totalorder %s415_s22, %s616_s1 }
   0x6   :  { %p421_p2 = pnand %p419_p1, %p416_p0 }
   0x8   :  { %424 = shalt.err (!%p421_p2)
}
   0x9   :  { %s425_s27 = scalar_lea.vmem %s31_s19, 1024  ;;  %p430_p4 = scmp.lt.s32.totalorder %s31_s19, %s31_s19 }
   0xa   :  { %p426_p3 = scmp.ne.s32.totalorder %s31_s19, %s425_s27  ;;  %p431_p5 = scmp.lt.s32.totalorder %s425_s27, %s425_s27 }
   0xc   :  { %p432_p6 = por %p431_p5, %p430_p4 }
   0xe   :  { %p433_p7 = pnand %p432_p6, %p426_p3 }
  0x10   :  { %436 = shalt.err (!%p433_p7)
}
  0x11   :  { %s510_s28 = smov 64   ;;  %s511_s29 = smov 4  }
  0x12   :  { %36 = dma.hbm_to_vmem [thread:$0]  %s616_s1, 1024, %s31_s19, [#allocation6], %s510_s28, %s510_s28, %s511_s29  }
  0x13   :  { %s512_s7 = smov [#allocation2]   ;;  %s437_s11 = scalar_lea.hbm %s615_s0, 256 }
  0x14   :  { %s18_s8 = sshll.u32 %s512_s7, 4  ;;  %p438_p8 = scmp.ne.s32.totalorder %s615_s0, %s437_s11  ;;  %s19_s8 = int_to_ptr.vmem [resolvable:$true] %s18_s8 }
  0x15   :  { %p441_p9 = scmp.lt.u32.totalorder %s437_s11, %s615_s0 }
  0x17   :  { %p443_p10 = pnand %p441_p9, %p438_p8 }
  0x19   :  { %446 = shalt.err (!%p443_p10)
}
  0x1a   :  { %s447_s16 = scalar_lea.vmem %s19_s8, 256  ;;  %p452_p12 = scmp.lt.s32.totalorder %s19_s8, %s19_s8 }
  0x1b   :  { %p448_p11 = scmp.ne.s32.totalorder %s19_s8, %s447_s16  ;;  %p453_p13 = scmp.lt.s32.totalorder %s447_s16, %s447_s16 }
  0x1d   :  { %p454_p0 = por %p453_p13, %p452_p12 }
  0x1f   :  { %p455_p1 = pnand %p454_p0, %p448_p11 }
  0x21   :  { %458 = shalt.err (!%p455_p1)
}
  0x22   :  { %s513_s1 = smov 128   ;;  %s514_s17 = smov 8  }
  0x23   :  { %24 = dma.hbm_to_vmem [thread:$0]  %s615_s0, 256, %s19_s8, [#allocation3], %s513_s1, %s513_s1, %s514_s17  }
  0x24   :  { %s515_s20 = smov [#allocation7]   ;;  %s459_s24 = scalar_lea.hbm %s618_s3, 1024 }
  0x25   :  { %s44_s21 = sshll.u32 %s515_s20, 4  ;;  %p460_p2 = scmp.ne.s32.totalorder %s618_s3, %s459_s24  ;;  %s45_s21 = int_to_ptr.vmem [resolvable:$true] %s44_s21 }
  0x26   :  { %p463_p3 = scmp.lt.u32.totalorder %s459_s24, %s618_s3 }
  0x28   :  { %p465_p4 = pnand %p463_p3, %p460_p2 }
  0x2a   :  { %468 = shalt.err (!%p465_p4)
}
  0x2b   :  { %s469_s6 = scalar_lea.vmem %s45_s21, 1024  ;;  %p474_p6 = scmp.lt.s32.totalorder %s45_s21, %s45_s21 }
  0x2c   :  { %p470_p5 = scmp.ne.s32.totalorder %s45_s21, %s469_s6  ;;  %p475_p7 = scmp.lt.s32.totalorder %s469_s6, %s469_s6 }
  0x2e   :  { %p476_p8 = por %p475_p7, %p474_p6 }
  0x30   :  { %p477_p9 = pnand %p476_p8, %p470_p5 }
  0x32   :  { %480 = shalt.err (!%p477_p9)
}
  0x33   :  { %50 = dma.hbm_to_vmem [thread:$0]  %s618_s3, 1024, %s45_s21, [#allocation6], %s510_s28, %s510_s28, %s511_s29  }
  0x34   :  { %503 = dma.done.wait [#allocation3], 256  }
  0x35   :  { %504 = vsyncadd [#allocation3], 4294967040 }
  0x36   :  { %505 = dma.done.wait [#allocation6], 2048  }
  0x37   :  { %506 = vsyncadd [#allocation6], 4294965248  ;;  %v516_v0 = vmov 0.0   ;;  %vm517_vm0 = vmmov 0   ;;  %v399_v1 = vld [vmem:[#allocation5] sm:$0xff]   ;;  %v400_v2 = vld [vmem:[#allocation5 + $0x8] sm:$0xff]  }
  0x38   :  { %349 = vmatprep.subr.bf16.mxu0 %v516_v0  ;;  %365 = vmatprep.mubr.msk.bf16.mxu0 %vm517_vm0, %v516_v0  ;;  %v401_v3 = vld [vmem:[#allocation5 + $0x10] sm:$0xff]   ;;  %v407_v4 = vld [vmem:[#allocation7] sm:$0xff]   ;;  %v402_v5 = vld [vmem:[#allocation5 + $0x18] sm:$0xff]   ;;  %s518_s9 = smov [#allocation8]  }
  0x39   :  { %369 = vmatprep.subr.bf16.mxu1 %v516_v0  ;;  %385 = vmatprep.mubr.msk.bf16.mxu1 %vm517_vm0, %v516_v0  ;;  %v408_v6 = vld [vmem:[#allocation7 + $0x8] sm:$0xff]   ;;  %v403_v7 = vld [vmem:[#allocation5 + $0x20] sm:$0xff]   ;;  %v409_v8 = vld [vmem:[#allocation7 + $0x10] sm:$0xff]   ;;  %s300_s10 = sshll.u32 %s518_s9, 4  ;;  %s301_s10 = int_to_ptr.vmem [resolvable:$true] %s300_s10 }
  0x3a   :  { %350 = vmatpush3.bf16.msra.mxu0 %v399_v1  ;;  %370 = vmatpush3.bf16.msra.mxu1 %v407_v4  ;;  %v404_v9 = vld [vmem:[#allocation5 + $0x28] sm:$0xff]   ;;  %v410_v10 = vld [vmem:[#allocation7 + $0x18] sm:$0xff]   ;;  %v405_v11 = vld [vmem:[#allocation5 + $0x30] sm:$0xff]   ;;  %p486_p11 = scmp.lt.s32.totalorder %s301_s10, %s301_s10 }
  0x3b   :  { %351 = vmatprep.subr.bf16.mxu0 %v516_v0  ;;  %371 = vmatprep.subr.bf16.mxu1 %v516_v0  ;;  %v411_v12 = vld [vmem:[#allocation7 + $0x20] sm:$0xff]   ;;  %v406_v13 = vld [vmem:[#allocation5 + $0x38] sm:$0xff]   ;;  %v63_v14 = vld [vmem:[#allocation2] sm:$0xff] }
  0x3c   :  { %v64_v15 = vld [vmem:[#allocation2 + $0x8] sm:$0xff]  ;;  %v412_v16 = vld [vmem:[#allocation7 + $0x28] sm:$0xff]   ;;  %v413_v18 = vld [vmem:[#allocation7 + $0x30] sm:$0xff]  }
  0x3d   :  { %v65_v17 = vpack.c.bf16 %v64_v15, %v63_v14  ;;  %v414_v19 = vld [vmem:[#allocation7 + $0x38] sm:$0xff]   ;;  %v313_v20 = vld [vmem:[%s617_s2] ss:$0 sm:$0xff]  ;;  %s481_s2 = scalar_lea.vmem %s301_s10, 256 }
  0x3e   :  { %352 = vmatpush3.bf16.msra.mxu0 %v400_v2  ;;  %372 = vmatpush3.bf16.msra.mxu1 %v408_v6  ;;  %v322_v30 = vld [vmem:[%s619_s4] ss:$0 sm:$0xff]  ;;  %p482_p10 = scmp.ne.s32.totalorder %s301_s10, %s481_s2  ;;  %p487_p12 = scmp.lt.s32.totalorder %s481_s2, %s481_s2 }
  0x3f   :  { %353 = vmatprep.subr.bf16.mxu0 %v516_v0  ;;  %373 = vmatprep.subr.bf16.mxu1 %v516_v0 }
  0x40   :  { %p488_p13 = por %p487_p12, %p486_p11 }
  0x42   :  { %354 = vmatpush3.bf16.msra.mxu0 %v401_v3  ;;  %374 = vmatpush3.bf16.msra.mxu1 %v409_v8  ;;  %p489_p0 = pnand %p488_p13, %p482_p10 }
  0x43   :  { %355 = vmatprep.subr.bf16.mxu0 %v516_v0  ;;  %375 = vmatprep.subr.bf16.mxu1 %v516_v0 }
  0x46   :  { %356 = vmatpush3.bf16.msra.mxu0 %v402_v5  ;;  %376 = vmatpush3.bf16.msra.mxu1 %v410_v10 }
  0x47   :  { %357 = vmatprep.subr.bf16.mxu0 %v516_v0  ;;  %377 = vmatprep.subr.bf16.mxu1 %v516_v0 }
  0x4a   :  { %358 = vmatpush3.bf16.msra.mxu0 %v403_v7  ;;  %378 = vmatpush3.bf16.msra.mxu1 %v411_v12 }
  0x4b   :  { %359 = vmatprep.subr.bf16.mxu0 %v516_v0  ;;  %379 = vmatprep.subr.bf16.mxu1 %v516_v0 }
  0x4e   :  { %360 = vmatpush3.bf16.msra.mxu0 %v404_v9  ;;  %380 = vmatpush3.bf16.msra.mxu1 %v412_v16 }
  0x4f   :  { %361 = vmatprep.subr.bf16.mxu0 %v516_v0  ;;  %381 = vmatprep.subr.bf16.mxu1 %v516_v0 }
  0x52   :  { %362 = vmatpush3.bf16.msra.mxu0 %v405_v11  ;;  %382 = vmatpush3.bf16.msra.mxu1 %v413_v18 }
  0x53   :  { %363 = vmatprep.subr.bf16.mxu0 %v516_v0  ;;  %383 = vmatprep.subr.bf16.mxu1 %v516_v0 }
  0x56   :  { %364 = vmatpush3.bf16.msra.mxu0 %v406_v13  ;;  %384 = vmatpush3.bf16.msra.mxu1 %v414_v19 }
  0x59   :  { %366 = vmatmul.mubr.bf16.vlgmr.msra.gmra.mrb[0].mxu0 %v65_v17 }
 0x12c   :  { %v171_v21 = vpop.f32.mrb[0].mxu0 }
 0x12d   :  { %v172_v22 = vadd.f32 %v313_v20, %v171_v21  ;;  %v367_v23 = vpop.f32.mrb[1].mxu0 }
 0x12e   :  { %v174_v24 = vpop.f32.mrb[2].mxu0 }
 0x12f   :  { %v175_v25 = vadd.f32 %v313_v20, %v174_v24  ;;  %v368_v26 = vpop.f32.mrb[3].mxu0  ;;  %v178_v27 = vmax.f32 %v172_v22, 0.0 }
 0x131   :  { %v179_v28 = vmax.f32 %v175_v25, 0.0 }
 0x133   :  { %v180_v29 = vpack.c.bf16 %v179_v28, %v178_v27 }
 0x135   :  { %386 = vmatmul.mubr.bf16.vlgmr.msra.gmra.mrb[0].mxu1 %v180_v29 }
 0x208   :  { %v286_v31 = vpop.f32.mrb[0].mxu1 }
 0x209   :  { %v287_v32 = vadd.f32 %v322_v30, %v286_v31  ;;  %v387_v33 = vpop.f32.mrb[1].mxu1 }
 0x20a   :  { %v289_v34 = vpop.f32.mrb[2].mxu1 }
 0x20b   :  { %293 = vst [vmem:[#allocation8] sm:$0xff] %v287_v32  ;;  %v290_v35 = vadd.f32 %v322_v30, %v289_v34  ;;  %v388_v36 = vpop.f32.mrb[3].mxu1 }
 0x20d   :  { %294 = vst [vmem:[#allocation8 + $0x8] sm:$0xff] %v290_v35 }
 0x20e   :  { %492 = shalt.err (!%p489_p0)
}
 0x20f   :  { %s493_s12 = scalar_lea.hbm %s620_s5, 256 }
 0x210   :  { %p494_p1 = scmp.ne.s32.totalorder %s620_s5, %s493_s12  ;;  %p497_p2 = scmp.lt.u32.totalorder %s493_s12, %s620_s5 }
 0x212   :  { %p499_p3 = pnand %p497_p2, %p494_p1 }
 0x214   :  { %502 = shalt.err (!%p499_p3)
}
 0x215   :  { %306 = dma.vmem_to_hbm [thread:$0]  %s301_s10, 256, %s620_s5, [#allocation4], %s513_s1, %s513_s1, %s514_s17  }
 0x216   :  { %507 = dma.done.wait [#allocation4], 256  }
 0x217   :  { %508 = vsyncadd [#allocation4], 4294967040 }
 0x218   :  { %310 = vsyncpa [#allocation3], 1 }
 0x219   :  { %311 = vsyncpa [#allocation6], 1 }
 0x21a   :  { %312 = vsyncpa [#allocation4], 1 }

</bundles_post_ra>
